<compile_context>
chip_gen: v7x
topology: tpu7x:2x2x1
jax: 0.10.0
libtpu: 0.0.40
codegen_flags: <defaults>
</compile_context>

<pallas_src>
import jax
import jax.numpy as jnp
from jax.experimental import pallas as pl
from jax.experimental.pallas import tpu as pltpu


def _round_up(n, m):
    return ((n + m - 1) // m) * m


def mlp_kernel(x_ref, w1_ref, b1_ref, w2_ref, b2_ref, o_ref):
    # fc1: (TB, Dp) @ (Dp, Hp) + (1, Hp), f32 accumulation on the MXU.
    h = jnp.dot(x_ref[...], w1_ref[...], preferred_element_type=jnp.float32)
    h = jnp.maximum(h + b1_ref[...], 0.0)              # ReLU
    # nn.Dropout in eval mode == identity.
    # fc2: (TB, Hp) @ (Hp, Op) + (1, Op); cast activations to the weight dtype
    # so bf16 weights feed the MXU directly; accumulate in f32.
    out = jnp.dot(h.astype(w2_ref.dtype), w2_ref[...],
                  preferred_element_type=jnp.float32)
    o_ref[...] = (out + b2_ref[...]).astype(o_ref.dtype)


def prepare_mlp_params(w1, b1, w2, b2, *, weight_dtype=None):
    """Pad/cast the weights ONCE (hoisted out of the per-call forward path).

    w1: (D, H), w2: (H, O) are (in_features, out_features), i.e. already the
    transpose of PyTorch's nn.Linear.weight.  Padding to lane multiples of 128
    is mathematically inert (zero rows/cols + zero bias lanes).
    """
    D, H = w1.shape
    O = w2.shape[1]
    wdt = jnp.dtype(weight_dtype) if weight_dtype is not None else jnp.dtype(w1.dtype)
    Dp, Hp, Op = _round_up(D, 128), _round_up(H, 128), _round_up(O, 128)
    w1p = jnp.zeros((Dp, Hp), wdt).at[:D, :H].set(w1.astype(wdt))
    w2p = jnp.zeros((Hp, Op), wdt).at[:H, :O].set(w2.astype(wdt))
    b1p = jnp.zeros((1, Hp), jnp.float32).at[:, :H].set(
        b1.astype(jnp.float32).reshape(1, H))
    b2p = jnp.zeros((1, Op), jnp.float32).at[:, :O].set(
        b2.astype(jnp.float32).reshape(1, O))
    return {"w1": w1p, "b1": b1p, "w2": w2p, "b2": b2p,
            "dims": (D, H, O), "dtype": wdt}


def _pick_batch_tile(B, row_mult, target):
    """Batch tile: as close to `target` as B allows, a multiple of `row_mult`
    (8 for f32, 16 for bf16 sublane packing), and — when B permits — small
    enough that the grid has >= 2 steps (megacore sharding + pipelining)."""
    bp_min = _round_up(B, row_mult)
    tb = _round_up(min(target, bp_min), row_mult)
    if bp_min // tb < 2 and bp_min >= 2 * row_mult:
        tb = _round_up(-(-bp_min // 2), row_mult)
    return tb


def _vmem_budget_bytes():
    try:
        cap = pltpu.get_tpu_info().vmem_capacity_bytes
    except Exception:
        cap = 64 << 20                      # conservative (v7x per-core VMEM)
    return int(cap * 0.85)                  # headroom for Mosaic's own scratch


def mlp_forward(x, params, *, block_b=256):
    """y = relu(x @ W1 + b1) @ W2 + b2  (dropout == identity in eval mode).

    `params` must come from prepare_mlp_params; only x is padded per call.
    """
    D, H, O = params["dims"]
    w1p, b1p, w2p, b2p = params["w1"], params["b1"], params["w2"], params["b2"]
    compute_dtype = params["dtype"]
    Dp, Hp = w1p.shape
    Op = w2p.shape[1]

    B = x.shape[0]
    out_dtype = x.dtype
    itemsize = jnp.dtype(compute_dtype).itemsize
    out_itemsize = jnp.dtype(out_dtype).itemsize

    row_mult = 16 if itemsize < 4 else 8
    TB = _pick_batch_tile(B, row_mult, block_b)
    Bp = _round_up(B, TB)
    grid = (Bp // TB,)

    # Only the activations are padded per call.
    xp = jnp.zeros((Bp, Dp), compute_dtype).at[:B, :D].set(x.astype(compute_dtype))

    weight_bytes = (Dp * Hp + Hp * Op) * itemsize + (Hp + Op) * 4
    tile_bytes = TB * Dp * itemsize + TB * Op * out_itemsize
    budget = _vmem_budget_bytes()

    cost = pl.CostEstimate(
        flops=2 * Bp * (Dp * Hp + Hp * Op),
        transcendentals=0,
        bytes_accessed=(Bp * Dp + Dp * Hp + Hp * Op) * itemsize
        + (Hp + Op) * 4 + Bp * Op * out_itemsize,
    )

    def _run(single_buffer_weights):
        if single_buffer_weights:
            # Constant-index blocks: single-buffer the resident weights so they
            # only cost 1x VMEM (Pallas double-buffers every input by default).
            def resident(shape):
                return pl.BlockSpec(shape, lambda i: (0, 0),
                                    pipeline_mode=pl.Buffered(1))
            w_copies = 1
        else:
            def resident(shape):
                return pl.BlockSpec(shape, lambda i: (0, 0))
            w_copies = 2

        needed = 2 * tile_bytes + w_copies * weight_bytes + (4 << 20)
        # Generous up to ~85% of this generation's VMEM, but NEVER below what
        # the kernel actually needs (review: no under-request / silent spill).
        # TODO(synk): if `needed` ever exceeds `budget` (huge hidden dims),
        #             switch to an Hp-tiled reduction grid instead of failing.
        vmem_limit = min(max(needed, 32 << 20), budget)
        vmem_limit = int(max(vmem_limit, needed))

        return pl.pallas_call(
            mlp_kernel,
            out_shape=jax.ShapeDtypeStruct((Bp, Op), out_dtype),
            grid=grid,
            in_specs=[
                pl.BlockSpec((TB, Dp), lambda i: (i, 0)),   # x: streamed tiles
                resident((Dp, Hp)),                         # W1: VMEM-resident
                resident((1, Hp)),                          # b1
                resident((Hp, Op)),                         # W2: VMEM-resident
                resident((1, Op)),                          # b2
            ],
            out_specs=pl.BlockSpec((TB, Op), lambda i: (i, 0)),
            compiler_params=pltpu.CompilerParams(
                dimension_semantics=("parallel",),          # batch across TCs
                vmem_limit_bytes=vmem_limit,
            ),
            cost_estimate=cost,
        )(xp, w1p, b1p, w2p, b2p)

    try:
        out = _run(True)
    except Exception:
        # Portable fallback: default double-buffered specs.
        out = _run(False)

    # Strip batch / output-lane padding outside the kernel.
    return out[:B, :O]


def init_params(key, input_dim, hidden_dim, output_dim, dtype=jnp.float32):
    """Deterministic init mimicking nn.Linear's U(-1/sqrt(fan_in), 1/sqrt(fan_in))."""
    k1, k2, k3, k4 = jax.random.split(key, 4)
    bound1 = 1.0 / (input_dim ** 0.5)
    bound2 = 1.0 / (hidden_dim ** 0.5)
    w1 = jax.random.uniform(k1, (input_dim, hidden_dim), dtype, -bound1, bound1)
    b1 = jax.random.uniform(k2, (hidden_dim,), dtype, -bound1, bound1)
    w2 = jax.random.uniform(k3, (hidden_dim, output_dim), dtype, -bound2, bound2)
    b2 = jax.random.uniform(k4, (output_dim,), dtype, -bound2, bound2)
    return w1, b1, w2, b2


if __name__ == "__main__":
    # Module defaults: input_dim=32, hidden_dim=64, output_dim=2; batch=32.
    B, D, H, O = 32, 32, 64, 2
    key = jax.random.PRNGKey(0)
    kx, kp = jax.random.split(key)
    x = jax.random.normal(kx, (B, D), jnp.float32)
    w1, b1, w2, b2 = init_params(kp, D, H, O)

    # Pure-JAX reference (fc1 -> relu -> eval-mode dropout -> fc2), highest
    # precision so the comparison is against a true-f32 result.
    hi = jax.lax.Precision.HIGHEST
    ref = jnp.dot(jnp.maximum(jnp.dot(x, w1, precision=hi) + b1, 0.0),
                  w2, precision=hi) + b2

    # f32 path (weights padded once, reused across calls).
    params_f32 = prepare_mlp_params(w1, b1, w2, b2)
    out = jax.block_until_ready(mlp_forward(x, params_f32))
    assert out.shape == (B, O)
    assert jnp.allclose(out, ref, atol=1e-4, rtol=1e-4)

    # bf16 weight/activation storage path (recommended on v5e/v6e/v7x);
    # MXU accumulation stays f32.
    params_bf16 = prepare_mlp_params(w1, b1, w2, b2, weight_dtype=jnp.bfloat16)
    out_bf16 = jax.block_until_ready(mlp_forward(x, params_bf16))
    assert out_bf16.shape == (B, O)
    assert jnp.allclose(out_bf16.astype(jnp.float32), ref, atol=5e-2, rtol=5e-2)

    print("KERNEL_OK")
</pallas_src>

<mosaic_0001>
module attributes {stable_mosaic.version = 11 : i64} {
  func.func @mlp_kernel(%arg0: i32, %arg1: memref<16x128xf32, #tpu.memory_space<vmem>>, %arg2: memref<128x128xf32, #tpu.memory_space<vmem>>, %arg3: memref<1x128xf32, #tpu.memory_space<vmem>>, %arg4: memref<128x128xf32, #tpu.memory_space<vmem>>, %arg5: memref<1x128xf32, #tpu.memory_space<vmem>>, %arg6: memref<16x128xf32, #tpu.memory_space<vmem>>) attributes {dimension_semantics = [#tpu.dimension_semantics<parallel>], iteration_bounds = array<i64: 2>, scalar_prefetch = 0 : i64, scratch_operands = 0 : i64, tpu.core_type = #tpu.core_type<tc>, window_params = [{transform_indices = @transform_0, window_bounds = array<i64: 16, 128>}, {pipeline_mode = #tpu.pipeline_mode<synchronous>, transform_indices = @transform_1, window_bounds = array<i64: 128, 128>}, {pipeline_mode = #tpu.pipeline_mode<synchronous>, transform_indices = @transform_2, window_bounds = array<i64: 1, 128>}, {pipeline_mode = #tpu.pipeline_mode<synchronous>, transform_indices = @transform_3, window_bounds = array<i64: 128, 128>}, {pipeline_mode = #tpu.pipeline_mode<synchronous>, transform_indices = @transform_4, window_bounds = array<i64: 1, 128>}, {transform_indices = @transform_5, window_bounds = array<i64: 16, 128>}]} {
    %c0 = arith.constant 0 : index
    %c0_0 = arith.constant 0 : index
    %0 = vector.load %arg1[%c0, %c0_0] : memref<16x128xf32, #tpu.memory_space<vmem>>, vector<16x128xf32>
    %c0_1 = arith.constant 0 : index
    %c0_2 = arith.constant 0 : index
    %1 = vector.load %arg2[%c0_1, %c0_2] : memref<128x128xf32, #tpu.memory_space<vmem>>, vector<128x128xf32>
    %cst = arith.constant dense<0.000000e+00> : vector<16x128xf32>
    %2 = tpu.matmul %0, %1, %cst {dimension_numbers = #tpu.dot_dimension_numbers<[1], [0], [0], [1], [0, 0, 1, 1], [], []>} : vector<16x128xf32>, vector<128x128xf32>, vector<16x128xf32> -> vector<16x128xf32>
    %c0_3 = arith.constant 0 : index
    %c0_4 = arith.constant 0 : index
    %3 = vector.load %arg3[%c0_3, %c0_4] : memref<1x128xf32, #tpu.memory_space<vmem>>, vector<1x128xf32>
    %4 = vector.broadcast %3 : vector<1x128xf32> to vector<16x128xf32>
    %5 = arith.addf %2, %4 : vector<16x128xf32>
    %cst_5 = arith.constant 0.000000e+00 : f32
    %6 = vector.broadcast %cst_5 : f32 to vector<16x128xf32>
    %7 = arith.maximumf %5, %6 : vector<16x128xf32>
    %c0_6 = arith.constant 0 : index
    %c0_7 = arith.constant 0 : index
    %8 = vector.load %arg4[%c0_6, %c0_7] : memref<128x128xf32, #tpu.memory_space<vmem>>, vector<128x128xf32>
    %cst_8 = arith.constant dense<0.000000e+00> : vector<16x128xf32>
    %9 = tpu.matmul %7, %8, %cst_8 {dimension_numbers = #tpu.dot_dimension_numbers<[1], [0], [0], [1], [0, 0, 1, 1], [], []>} : vector<16x128xf32>, vector<128x128xf32>, vector<16x128xf32> -> vector<16x128xf32>
    %c0_9 = arith.constant 0 : index
    %c0_10 = arith.constant 0 : index
    %10 = vector.load %arg5[%c0_9, %c0_10] : memref<1x128xf32, #tpu.memory_space<vmem>>, vector<1x128xf32>
    %11 = vector.broadcast %10 : vector<1x128xf32> to vector<16x128xf32>
    %12 = arith.addf %9, %11 : vector<16x128xf32>
    %c0_11 = arith.constant 0 : index
    %c0_12 = arith.constant 0 : index
    %13 = vector.load %arg6[%c0_11, %c0_12] : memref<16x128xf32, #tpu.memory_space<vmem>>, vector<16x128xf32>
    tpu.vector_store %arg6[%c0_11, %c0_12], %12 {strides = array<i32>} : memref<16x128xf32, #tpu.memory_space<vmem>>, vector<16x128xf32>,
    return
  }
  func.func @transform_0(%arg0: i32) -> (i32, i32) {
    %c0_i32 = arith.constant 0 : i32
    %c0_i32_0 = arith.constant 0 : i32
    return %arg0, %c0_i32 : i32, i32
  }
  func.func @transform_1(%arg0: i32) -> (i32, i32) {
    %c0_i32 = arith.constant 0 : i32
    %c0_i32_0 = arith.constant 0 : i32
    %c0_i32_1 = arith.constant 0 : i32
    return %c0_i32, %c0_i32_0 : i32, i32
  }
  func.func @transform_2(%arg0: i32) -> (i32, i32) {
    %c0_i32 = arith.constant 0 : i32
    %c0_i32_0 = arith.constant 0 : i32
    %c0_i32_1 = arith.constant 0 : i32
    return %c0_i32, %c0_i32_0 : i32, i32
  }
  func.func @transform_3(%arg0: i32) -> (i32, i32) {
    %c0_i32 = arith.constant 0 : i32
    %c0_i32_0 = arith.constant 0 : i32
    %c0_i32_1 = arith.constant 0 : i32
    return %c0_i32, %c0_i32_0 : i32, i32
  }
  func.func @transform_4(%arg0: i32) -> (i32, i32) {
    %c0_i32 = arith.constant 0 : i32
    %c0_i32_0 = arith.constant 0 : i32
    %c0_i32_1 = arith.constant 0 : i32
    return %c0_i32, %c0_i32_0 : i32, i32
  }
  func.func @transform_5(%arg0: i32) -> (i32, i32) {
    %c0_i32 = arith.constant 0 : i32
    %c0_i32_0 = arith.constant 0 : i32
    return %arg0, %c0_i32 : i32, i32
  }
}

module attributes {stable_mosaic.version = 11 : i64} {
  func.func @mlp_kernel(%arg0: i32, %arg1: memref<16x128xf32, #tpu.memory_space<vmem>>, %arg2: memref<128x128xf32, #tpu.memory_space<vmem>>, %arg3: memref<1x128xf32, #tpu.memory_space<vmem>>, %arg4: memref<128x128xf32, #tpu.memory_space<vmem>>, %arg5: memref<1x128xf32, #tpu.memory_space<vmem>>, %arg6: memref<16x128xf32, #tpu.memory_space<vmem>>) attributes {dimension_semantics = [#tpu.dimension_semantics<parallel>], iteration_bounds = array<i64: 2>, scalar_prefetch = 0 : i64, scratch_operands = 0 : i64, tpu.core_type = #tpu.core_type<tc>, window_params = [{transform_indices = @transform_0, window_bounds = array<i64: 16, 128>}, {pipeline_mode = #tpu.pipeline_mode<synchronous>, transform_indices = @transform_1, window_bounds = array<i64: 128, 128>}, {pipeline_mode = #tpu.pipeline_mode<synchronous>, transform_indices = @transform_2, window_bounds = array<i64: 1, 128>}, {pipeline_mode = #tpu.pipeline_mode<synchronous>, transform_indices = @transform_3, window_bounds = array<i64: 128, 128>}, {pipeline_mode = #tpu.pipeline_mode<synchronous>, transform_indices = @transform_4, window_bounds = array<i64: 1, 128>}, {transform_indices = @transform_5, window_bounds = array<i64: 16, 128>}]} {
    %c0 = arith.constant 0 : index
    %c0_0 = arith.constant 0 : index
    %0 = vector.load %arg1[%c0, %c0_0] : memref<16x128xf32, #tpu.memory_space<vmem>>, vector<16x128xf32>
    %c0_1 = arith.constant 0 : index
    %c0_2 = arith.constant 0 : index
    %1 = vector.load %arg2[%c0_1, %c0_2] : memref<128x128xf32, #tpu.memory_space<vmem>>, vector<128x128xf32>
    %cst = arith.constant dense<0.000000e+00> : vector<16x128xf32>
    %2 = tpu.matmul %0, %1, %cst {dimension_numbers = #tpu.dot_dimension_numbers<[1], [0], [0], [1], [0, 0, 1, 1], [], []>} : vector<16x128xf32>, vector<128x128xf32>, vector<16x128xf32> -> vector<16x128xf32>
    %c0_3 = arith.constant 0 : index
    %c0_4 = arith.constant 0 : index
    %3 = vector.load %arg3[%c0_3, %c0_4] : memref<1x128xf32, #tpu.memory_space<vmem>>, vector<1x128xf32>
    %4 = vector.broadcast %3 : vector<1x128xf32> to vector<16x128xf32>
    %5 = arith.addf %2, %4 : vector<16x128xf32>
    %cst_5 = arith.constant 0.000000e+00 : f32
    %6 = vector.broadcast %cst_5 : f32 to vector<16x128xf32>
    %7 = arith.maximumf %5, %6 : vector<16x128xf32>
    %c0_6 = arith.constant 0 : index
    %c0_7 = arith.constant 0 : index
    %8 = vector.load %arg4[%c0_6, %c0_7] : memref<128x128xf32, #tpu.memory_space<vmem>>, vector<128x128xf32>
    %cst_8 = arith.constant dense<0.000000e+00> : vector<16x128xf32>
    %9 = tpu.matmul %7, %8, %cst_8 {dimension_numbers = #tpu.dot_dimension_numbers<[1], [0], [0], [1], [0, 0, 1, 1], [], []>} : vector<16x128xf32>, vector<128x128xf32>, vector<16x128xf32> -> vector<16x128xf32>
    %c0_9 = arith.constant 0 : index
    %c0_10 = arith.constant 0 : index
    %10 = vector.load %arg5[%c0_9, %c0_10] : memref<1x128xf32, #tpu.memory_space<vmem>>, vector<1x128xf32>
    %11 = vector.broadcast %10 : vector<1x128xf32> to vector<16x128xf32>
    %12 = arith.addf %9, %11 : vector<16x128xf32>
    %c0_11 = arith.constant 0 : index
    %c0_12 = arith.constant 0 : index
    %13 = vector.load %arg6[%c0_11, %c0_12] : memref<16x128xf32, #tpu.memory_space<vmem>>, vector<16x128xf32>
    tpu.vector_store %arg6[%c0_11, %c0_12], %12 {strides = array<i32>} : memref<16x128xf32, #tpu.memory_space<vmem>>, vector<16x128xf32>,
    return
  }
  func.func @transform_0(%arg0: i32) -> (i32, i32) {
    %c0_i32 = arith.constant 0 : i32
    %c0_i32_0 = arith.constant 0 : i32
    return %arg0, %c0_i32 : i32, i32
  }
  func.func @transform_1(%arg0: i32) -> (i32, i32) {
    %c0_i32 = arith.constant 0 : i32
    %c0_i32_0 = arith.constant 0 : i32
    %c0_i32_1 = arith.constant 0 : i32
    return %c0_i32, %c0_i32_0 : i32, i32
  }
  func.func @transform_2(%arg0: i32) -> (i32, i32) {
    %c0_i32 = arith.constant 0 : i32
    %c0_i32_0 = arith.constant 0 : i32
    %c0_i32_1 = arith.constant 0 : i32
    return %c0_i32, %c0_i32_0 : i32, i32
  }
  func.func @transform_3(%arg0: i32) -> (i32, i32) {
    %c0_i32 = arith.constant 0 : i32
    %c0_i32_0 = arith.constant 0 : i32
    %c0_i32_1 = arith.constant 0 : i32
    return %c0_i32, %c0_i32_0 : i32, i32
  }
  func.func @transform_4(%arg0: i32) -> (i32, i32) {
    %c0_i32 = arith.constant 0 : i32
    %c0_i32_0 = arith.constant 0 : i32
    %c0_i32_1 = arith.constant 0 : i32
    return %c0_i32, %c0_i32_0 : i32, i32
  }
  func.func @transform_5(%arg0: i32) -> (i32, i32) {
    %c0_i32 = arith.constant 0 : i32
    %c0_i32_0 = arith.constant 0 : i32
    return %arg0, %c0_i32 : i32, i32
  }
}

</mosaic_0001>

<bundles_post_ra>
// kernel: tpu_custom_call.1
= control target key start
LH: loop header
LB: loop body
LE: loop exit
PB: predicated region body
PF: predicated region fallthrough
CT: control target
= control target key end

     0   :  { %10 = vsyncpa [#allocation3], 0  ;;  %s1298_s0 = inlined_call_operand.hbm [shape: f32[32,128], index: 0, kind: input, shape index: {}]   ;;  %s1299_s1 = inlined_call_operand.hbm [shape: f32[128,128], index: 1, kind: input, shape index: {}]   ;;  %s1300_s2 = inlined_call_operand.vmem [shape: f32[1,128], index: 2, kind: input, shape index: {}]   ;;  %s1301_s3 = inlined_call_operand.hbm [shape: f32[128,128], index: 3, kind: input, shape index: {}]   ;;  %s1302_s4 = inlined_call_operand.vmem [shape: f32[1,128], index: 4, kind: input, shape index: {}]   ;;  %s1303_s5 = inlined_call_operand.hbm [shape: f32[32,128], index: 5, kind: output, shape index: {}]  }
   0x1   :  { %12 = vsyncpa [#allocation3 + $0x1], 0 }
   0x2   :  { %13 = vsyncpa [#allocation6], 0 }
   0x3   :  { %14 = vsyncpa [#allocation4], 0 }
   0x4   :  { %16 = vsyncpa [#allocation4 + $0x1], 0  ;;  %s1041_s18 = smov 0   ;;  %s1043_s19 = smov 0  }
   0x5   :  { %s1045_s20 = smov 0   ;;  %s1047_s21 = smov 0  }
   0x6 LB: > { %s1062_s22 = sadd.s32 4294967295, %s1001_s21   ;;  %s582_s23 = sadd.s32 4294967294, %s1001_s21   ;;  %s1001_s21 = sphi %s1047_s21, %s1323_s21   ;;  %s997_s20 = sphi %s1045_s20, %s1322_s20   ;;  %s993_s19 = sphi %s1043_s19, %s1321_s19   ;;  %s989_s18 = sphi %s1041_s18, %s1320_s18  }
   0x7   : > { %p42_p0 = scmp.ne.s32.totalorder %s993_s19, %s989_s18  ;;  %p1304_p1 = scmp.eq.s32.totalorder %s1062_s22, 0 }
   0x8   : > { %p156_p3 = scmp.eq.s32.totalorder %s582_s23, 1  ;;  %p583_p5 = scmp.ge.s32.totalorder %s1001_s21, 1 }
   0x9   : > { %p1071_p4 = por %p1304_p1, %p42_p0  ;;  %p163_p7 = scmp.lt.s32.totalorder %s1001_s21, 3 }
   0xa   : > { %p1076_p6 = por %p156_p3, %p42_p0  ;;  %s1003_s27 = smov [#allocation5]  }
   0xb   : > { %s1307_s24 = scalar_select %p1071_p4, 1, 0 }
   0xc   : > { %s1308_s25 = scalar_select %p1076_p6, 1, 0 }
   0xd   : > { %p1081_p8 = pnand %p583_p5, %p163_p7  ;;  %s175_s28 = sshll.u32 %s1003_s27, 4  ;;  %s1085_s28 = int_to_ptr.vmem [resolvable:$true] %s175_s28 }
   0xe   : > { %s1004_s30 = smov [#allocation7]   ;;  %s845_s9 = scalar_lea.hbm %s1299_s1, 2048 }
   0xf   : > { %p786_p9 = pneg %p1081_p8  ;;  %s191_s6 = sshll.u32 %s1004_s30, 4  ;;  %s1096_s6 = int_to_ptr.vmem [resolvable:$true] %s191_s6 }
  0x10   : > { %p846_p12 = scmp.ne.s32.totalorder %s1299_s1, %s845_s9  ;;  %p852_p5 = scmp.lt.u32.totalorder %s845_s9, %s1299_s1 }
  0x11   : > { %p1092_p11 = pnand %p786_p9, %p1304_p1 }
  0x13   : > { %p847_p13 = pneg %p1092_p11 }
  0x15   : > { %p848_p0 = pnand %p847_p13, %p846_p12 }
  0x17   : > { %p849_p3 = pneg %p848_p0 }
  0x19   : > { %p854_p7 = pnand %p852_p5, %p849_p3 }
  0x1b   : > { %857 = shalt.err (!%p854_p7)
}
  0x1c   : > { %s858_s14 = scalar_lea.vmem %s1085_s28, 2048  ;;  %p866_p2 = scmp.lt.s32.totalorder %s1085_s28, %s1085_s28 }
  0x1d   : > { %p859_p9 = scmp.ne.s32.totalorder %s1085_s28, %s858_s14  ;;  %p867_p12 = scmp.lt.s32.totalorder %s858_s14, %s858_s14 }
  0x1f   : > { %p861_p10 = pnand %p859_p9, %p847_p13  ;;  %p868_p0 = por %p867_p12, %p866_p2 }
  0x21   : > { %p862_p1 = pneg %p861_p10 }
  0x23   : > { %p869_p6 = pnand %p868_p0, %p862_p1 }
  0x25   : > { %872 = shalt.err (!%p869_p6)
}
  0x26   : > { %s1005_s15 = smov 128   ;;  %s1006_s16 = smov 8  }
  0x27   : > { %789 = dma.hbm_to_vmem [thread:$0]  (!%p1092_p11), %s1299_s1, 2048, %s1085_s28, [#allocation6], %s1005_s15, %s1005_s15, %s1006_s16  }
  0x28   : > { %s873_s7 = scalar_lea.hbm %s1301_s3, 2048 }
  0x29   : > { %p874_p1 = scmp.ne.s32.totalorder %s1301_s3, %s873_s7  ;;  %p880_p10 = scmp.lt.u32.totalorder %s873_s7, %s1301_s3 }
  0x2b   : > { %p876_p2 = pnand %p874_p1, %p847_p13 }
  0x2d   : > { %p877_p6 = pneg %p876_p2 }
  0x2f   : > { %p882_p3 = pnand %p880_p10, %p877_p6 }
  0x31   : > { %885 = shalt.err (!%p882_p3)
}
  0x32   : > { %s886_s28 = scalar_lea.vmem %s1096_s6, 2048  ;;  %p894_p12 = scmp.lt.s32.totalorder %s1096_s6, %s1096_s6 }
  0x33   : > { %p887_p5 = scmp.ne.s32.totalorder %s1096_s6, %s886_s28  ;;  %p895_p0 = scmp.lt.s32.totalorder %s886_s28, %s886_s28 }
  0x35   : > { %p889_p7 = pnand %p887_p5, %p847_p13  ;;  %p896_p1 = por %p895_p0, %p894_p12 }
  0x37   : > { %p890_p9 = pneg %p889_p7 }
  0x39   : > { %p897_p2 = pnand %p896_p1, %p890_p9 }
  0x3b   : > { %900 = shalt.err (!%p897_p2)
}
  0x3c   : > { %792 = dma.hbm_to_vmem [thread:$0]  (!%p1092_p11), %s1301_s3, 2048, %s1096_s6, [#allocation6], %s1005_s15, %s1005_s15, %s1006_s16  }
  0x3d   : > { %s1157_s29 = sadd.s32 1, %s1001_s21   ;;  %s29_s14 = sadd.s32 1, %s997_s20 }
  0x3e   : > { %s26_s17 = ssub.s32 %s1001_s21, %s1157_s29  ;;  %p36_p13 = scmp.ne.s32.totalorder %s997_s20, %s993_s19 }
  0x3f   : > { %p27_p6 = scmp.eq.s32.totalorder %s26_s17, 0  ;;  %p37_p10 = scmp.eq.s32.totalorder %s1001_s21, 0 }
  0x40   : > { %p1311_p3 = scmp.eq.s32.totalorder %s1062_s22, 1  ;;  %p803_p7 = scmp.lt.s32.totalorder %s1001_s21, 2 }
  0x41   : > { %s1173_s27 = scalar_select %p27_p6, %s997_s20, %s29_s14  }
  0x42   : > { %p1167_p5 = por %p1311_p3, %p36_p13  ;;  %p38_p9 = por %p37_p10, %p36_p13 }
  0x43   : > { %s208_s30 = sand.u32 1, %s997_s20   ;;  %s602_s6 = sshll.u32 %s1001_s21, 8 }
  0x44   : > { %s1312_s23 = scalar_select %p1167_p5, 1, 0 }
  0x45   : > { %s587_s7 = sshll.u32 %s208_s30, 4  ;;  %s1180_s10 = scalar_lea.hbm %s1298_s0, %s602_s6 }
  0x46   : > { %s212_s11 = scalar_lea.vmem [#allocation2], %s587_s7  ;;  %p1184_p11 = pnand %p803_p7, %p38_p9 }
  0x47   : > { %s219_s28 = sshll.u32 %s212_s11, 4  ;;  %s1188_s13 = scalar_lea.sflag [#allocation3], %s208_s30  ;;  %s1182_s28 = int_to_ptr.vmem [resolvable:$true] %s219_s28 }
  0x48   : > { %s901_s14 = scalar_lea.hbm %s1180_s10, 256  ;;  %p903_p0 = pneg %p1184_p11 }
  0x49   : > { %p902_p12 = scmp.ne.s32.totalorder %s1180_s10, %s901_s14  ;;  %s906_s6 = scalar_lea.hbm %s1298_s0, 512 }
  0x4a   : > { %p907_p13 = scmp.lt.u32.totalorder %s1180_s10, %s1298_s0  ;;  %p908_p6 = scmp.lt.u32.totalorder %s906_s6, %s901_s14 }
  0x4b   : > { %p904_p1 = pnand %p903_p0, %p902_p12  ;;  %p910_p3 = scmp.lt.u32.totalorder %s901_s14, %s1180_s10 }
  0x4c   : > { %p909_p10 = por %p908_p6, %p907_p13 }
  0x4d   : > { %p905_p2 = pneg %p904_p1 }
  0x4e   : > { %p911_p7 = por %p910_p3, %p909_p10 }
  0x50   : > { %p912_p9 = pnand %p911_p7, %p905_p2 }
  0x52   : > { %915 = shalt.err (!%p912_p9)
}
  0x53   : > { %s916_s30 = scalar_lea.vmem %s1182_s28, 256  ;;  %s1007_s11 = smov [#allocation2]  }
  0x54   : > { %p917_p12 = scmp.ne.s32.totalorder %s1182_s28, %s916_s30  ;;  %s921_s17 = sshll.u32 %s1007_s11, 4  ;;  %s922_s17 = int_to_ptr.vmem [resolvable:$false] %s921_s17 }
  0x55   : > { %s923_s7 = scalar_lea.vmem %s922_s17, 512  ;;  %p924_p4 = scmp.lt.s32.totalorder %s1182_s28, %s922_s17 }
  0x56   : > { %p919_p1 = pnand %p917_p12, %p903_p0  ;;  %p925_p13 = scmp.lt.s32.totalorder %s923_s7, %s916_s30 }
  0x58   : > { %p920_p5 = pneg %p919_p1  ;;  %p926_p6 = por %p925_p13, %p924_p4 }
  0x5a   : > { %p927_p10 = pnand %p926_p6, %p920_p5 }
  0x5c   : > { %930 = shalt.err (!%p927_p10)
}
  0x5d   : > { %796 = dma.hbm_to_vmem [thread:$0]  (!%p1184_p11), %s1180_s10, 256, %s1182_s28, %s1188_s13, %s1005_s15, %s1005_s15, %s1006_s16  }
  0x5e   : > { %231 = sbr.rel (%p1081_p8) target bundleno = 588 (0x24c), region = 40  ;;  %s1222_s14 = sand.u32 (!%p1081_p8), 1, %s993_s19  }
  0x5f   : > { %s591_s6 = sshll.u32 (!%p1081_p8), %s1222_s14, 4  ;;  %s234_s8 = scalar_lea.sflag (!%p1081_p8), [#allocation3], %s1222_s14 }
  0x60   : > { %s1228_s12 = scalar_lea.vmem (!%p1081_p8), [#allocation2], %s591_s6  ;;  %p1314_p4 = scmp.ne.s32.totalorder (!%p1081_p8), %s1307_s24, 0 }
  0x65   : > { %976 = dma.done.wait (%p1314_p4), %s234_s8, 256  }
  0x66   : > { %978 = vsyncadd (%p1314_p4), %s234_s8, 4294967040  ;;  %p1315_p5 = scmp.eq.s32.totalorder %s1062_s22, 0 }
  0x68   : > { %980 = dma.done.wait (%p1315_p5), [#allocation6], 4096   ;;  %p1316_p8 = pmov %p1315_p5 }
  0x69   : > { %v276_v0 = vld [vmem:[#allocation5] sm:$0xff]  ;;  %v277_v1 = vld [vmem:[#allocation5 + $0x8] sm:$0xff]  ;;  %v278_v2 = vld [vmem:[#allocation5 + $0x10] sm:$0xff]  ;;  %s271_s15 = scalar_lea.vmem [#allocation8], %s591_s6  ;;  %s603_s13 = sshll.u32 %s1062_s22, 8 }
  0x6a   : > { %982 = vsyncadd (%p1316_p8), [#allocation6], 4294963200  ;;  %v710_v3 = vpack.c.bf16 %v277_v1, %v276_v0  ;;  %v279_v4 = vld [vmem:[#allocation5 + $0x18] sm:$0xff]  ;;  %v280_v6 = vld [vmem:[#allocation5 + $0x20] sm:$0xff]  ;;  %s490_s16 = sshll.u32 %s271_s15, 4  ;;  %s1254_s11 = scalar_lea.hbm %s1303_s5, %s603_s13  ;;  %s1249_s16 = int_to_ptr.vmem [resolvable:$true] %s490_s16 }
  0x6b   : > { %v714_v5 = vpack.c.bf16 %v279_v4, %v278_v2  ;;  %v281_v7 = vld [vmem:[#allocation5 + $0x28] sm:$0xff]  ;;  %v282_v9 = vld [vmem:[#allocation5 + $0x30] sm:$0xff]  ;;  %v283_v10 = vld [vmem:[#allocation5 + $0x38] sm:$0xff]  ;;  %s477_s17 = scalar_lea.sflag [#allocation4], %s1222_s14  ;;  %s931_s7 = scalar_lea.vmem %s1249_s16, 256 }
  0x6c   : > { %711 = vmatprep.subr.bf16.mxu0 %v710_v3  ;;  %v718_v8 = vpack.c.bf16 %v281_v7, %v280_v6  ;;  %v274_v11 = vld [vmem:[%s1228_s12] sm:$0xff]  ;;  %v377_v13 = vld [vmem:[#allocation7 + $0x8] sm:$0xff]  ;;  %v379_v16 = vld [vmem:[#allocation7 + $0x18] sm:$0xff]  ;;  %v722_v20 = vpack.c.bf16 %v283_v10, %v282_v9  ;;  %p932_p11 = scmp.ne.s32.totalorder %s1249_s16, %s931_s7  ;;  %p1317_p0 = scmp.ne.s32.totalorder %s1312_s23, 0 }
  0x6d   : > { %713 = vmatpush3.bf16.msra.mxu0 %v710_v3  ;;  %672 = vmatprep.mubr.f32.mxu0 %v274_v11  ;;  %v376_v12 = vld [vmem:[#allocation7] sm:$0xff]  ;;  %v378_v14 = vld [vmem:[#allocation7 + $0x10] sm:$0xff]  ;;  %v381_v19 = vld [vmem:[#allocation7 + $0x28] sm:$0xff]  ;;  %s1008_s22 = smov [#allocation8]  }
  0x6e   : > { %715 = vmatprep.subr.bf16.mxu0 %v714_v5  ;;  %v742_v15 = vpack.c.bf16 %v377_v13, %v376_v12  ;;  %v746_v17 = vpack.c.bf16 %v379_v16, %v378_v14  ;;  %v380_v18 = vld [vmem:[#allocation7 + $0x20] sm:$0xff]  ;;  %v285_v22 = vld [vmem:[#allocation5 + $0x48] sm:$0xff]  ;;  %v382_v24 = vld [vmem:[#allocation7 + $0x30] sm:$0xff]  ;;  %p933_p2 = pnand %p932_p11, %p1317_p0  ;;  %s935_s6 = sshll.u32 %s1008_s22, 4  ;;  %s936_s6 = int_to_ptr.vmem [resolvable:$false] %s935_s6 }
  0x6f   : > { %v284_v21 = vld [vmem:[#allocation5 + $0x40] sm:$0xff]  ;;  %v750_v23 = vpack.c.bf16 %v381_v19, %v380_v18  ;;  %v383_v25 = vld [vmem:[#allocation7 + $0x38] sm:$0xff]  ;;  %v286_v27 = vld [vmem:[#allocation5 + $0x50] sm:$0xff]  ;;  %s937_s8 = scalar_lea.vmem %s936_s6, 512  ;;  %p938_p7 = scmp.lt.s32.totalorder %s1249_s16, %s936_s6 }
  0x70   : > { %743 = vmatprep.subr.bf16.mxu1 %v742_v15  ;;  %v726_v26 = vpack.c.bf16 %v285_v22, %v284_v21  ;;  %v287_v28 = vld [vmem:[#allocation5 + $0x58] sm:$0xff]  ;;  %v754_v29 = vpack.c.bf16 %v383_v25, %v382_v24  ;;  %v384_v30 = vld [vmem:[#allocation7 + $0x40] sm:$0xff]  ;;  %v385_v31 = vld [vmem:[#allocation7 + $0x48] sm:$0xff]  ;;  %p934_p3 = pneg %p933_p2  ;;  %p939_p9 = scmp.lt.s32.totalorder %s937_s8, %s931_s7 }
  0x71   : > { %717 = vmatpush3.bf16.msra.mxu0 %v714_v5  ;;  %745 = vmatpush3.bf16.msra.mxu1 %v742_v15  ;;  %v730_v32 = vpack.c.bf16 %v287_v28, %v286_v27  ;;  %v288_v33 = vld [vmem:[#allocation5 + $0x60] sm:$0xff]  ;;  %v289_v34 = vld [vmem:[#allocation5 + $0x68] sm:$0xff]  ;;  %v758_v35 = vpack.c.bf16 %v385_v31, %v384_v30  ;;  %v386_v36 = vld [vmem:[#allocation7 + $0x50] sm:$0xff] }
  0x72   : > { %719 = vmatprep.subr.bf16.mxu0 %v718_v8  ;;  %747 = vmatprep.subr.bf16.mxu1 %v746_v17  ;;  %v387_v37 = vld [vmem:[#allocation7 + $0x58] sm:$0xff]  ;;  %v734_v38 = vpack.c.bf16 %v289_v34, %v288_v33  ;;  %v290_v39 = vld [vmem:[#allocation5 + $0x70] sm:$0xff]  ;;  %v388_v42 = vld [vmem:[#allocation7 + $0x60] sm:$0xff]  ;;  %p940_p12 = por %p939_p9, %p938_p7 }
  0x73   : > { %v291_v40 = vld [vmem:[#allocation5 + $0x78] sm:$0xff]  ;;  %v762_v41 = vpack.c.bf16 %v387_v37, %v386_v36  ;;  %v389_v43 = vld [vmem:[#allocation7 + $0x68] sm:$0xff]  ;;  %v390_v47 = vld [vmem:[#allocation7 + $0x70] sm:$0xff] }
  0x74   : > { %v738_v44 = vpack.c.bf16 %v291_v40, %v290_v39  ;;  %v766_v45 = vpack.c.bf16 %v389_v43, %v388_v42  ;;  %v275_v46 = vld [vmem:[%s1228_s12 + $0x8] sm:$0xff]  ;;  %v595_v50 = vld [vmem:[%s1300_s2] ss:$0 sm:$0xff]  ;;  %p941_p1 = pnand %p940_p12, %p934_p3 }
  0x75   : > { %721 = vmatpush3.bf16.msra.mxu0 %v718_v8  ;;  %749 = vmatpush3.bf16.msra.mxu1 %v746_v17  ;;  %v391_v48 = vld [vmem:[#allocation7 + $0x78] sm:$0xff]  ;;  %v596_v57 = vld [vmem:[%s1302_s4] ss:$0 sm:$0xff] }
  0x76   : > { %723 = vmatprep.subr.bf16.mxu0 %v722_v20  ;;  %751 = vmatprep.subr.bf16.mxu1 %v750_v23  ;;  %v770_v49 = vpack.c.bf16 %v391_v48, %v390_v47 }
  0x79   : > { %725 = vmatpush3.bf16.msra.mxu0 %v722_v20  ;;  %753 = vmatpush3.bf16.msra.mxu1 %v750_v23 }
  0x7a   : > { %727 = vmatprep.subr.bf16.mxu0 %v726_v26  ;;  %755 = vmatprep.subr.bf16.mxu1 %v754_v29 }
  0x7d   : > { %729 = vmatpush3.bf16.msra.mxu0 %v726_v26  ;;  %757 = vmatpush3.bf16.msra.mxu1 %v754_v29 }
  0x7e   : > { %731 = vmatprep.subr.bf16.mxu0 %v730_v32  ;;  %759 = vmatprep.subr.bf16.mxu1 %v758_v35 }
  0x81   : > { %733 = vmatpush3.bf16.msra.mxu0 %v730_v32  ;;  %761 = vmatpush3.bf16.msra.mxu1 %v758_v35 }
  0x82   : > { %735 = vmatprep.subr.bf16.mxu0 %v734_v38  ;;  %763 = vmatprep.subr.bf16.mxu1 %v762_v41 }
  0x85   : > { %737 = vmatpush3.bf16.msra.mxu0 %v734_v38  ;;  %765 = vmatpush3.bf16.msra.mxu1 %v762_v41 }
  0x86   : > { %739 = vmatprep.subr.bf16.mxu0 %v738_v44  ;;  %767 = vmatprep.subr.bf16.mxu1 %v766_v45 }
  0x89   : > { %741 = vmatpush3.bf16.msra.mxu0 %v738_v44  ;;  %769 = vmatpush3.bf16.msra.mxu1 %v766_v45 }
  0x8a   : > { %771 = vmatprep.subr.bf16.mxu1 %v770_v49 }
  0x8c   : > { %673 = vmatmul.mubr.f32.vlgmr.msra.gmra.mrb[0].mxu0 %v275_v46 }
  0x8d   : > { %773 = vmatpush3.bf16.msra.mxu1 %v770_v49 }
 0x15f   : > { %v674_v51 = vpop.f32.mrb[0].mxu0 }
 0x160   : > { %v371_v52 = vadd.f32 %v674_v51, %v595_v50  ;;  %v365_v53 = vpop.f32.mrb[1].mxu0 }
 0x161   : > { %v366_v54 = vadd.f32 %v595_v50, %v365_v53 }
 0x162   : > { %v375_v56 = vmax.f32 %v371_v52, 0.0 }
 0x163   : > { %v374_v55 = vmax.f32 %v366_v54, 0.0 }
 0x165   : > { %707 = vmatprep.mubr.f32.mxu1 %v374_v55 }
 0x166   : > { %708 = vmatmul.mubr.f32.vlgmr.msra.gmra.mrb[0].mxu1 %v375_v56 }
 0x239   : > { %v709_v58 = vpop.f32.mrb[0].mxu1 }
 0x23a   : > { %v471_v59 = vadd.f32 %v709_v58, %v596_v57  ;;  %v465_v60 = vpop.f32.mrb[1].mxu1 }
 0x23b   : > { %v466_v61 = vadd.f32 %v596_v57, %v465_v60 }
 0x23c   : > { %475 = vst [vmem:[%s271_s15 + $0x8] sm:$0xff] %v471_v59 }
 0x23d   : > { %474 = vst [vmem:[%s271_s15] sm:$0xff] %v466_v61 }
 0x23e   : > { %944 = shalt.err (!%p941_p1)
}
 0x23f   : > { %s945_s12 = scalar_lea.hbm %s1254_s11, 256  ;;  %s949_s15 = scalar_lea.hbm %s1303_s5, 512 }
 0x240   : > { %p946_p13 = scmp.ne.s32.totalorder %s1254_s11, %s945_s12  ;;  %p950_p4 = scmp.lt.u32.totalorder %s1254_s11, %s1303_s5 }
 0x241   : > { %p951_p5 = scmp.lt.u32.totalorder %s949_s15, %s945_s12  ;;  %p953_p11 = scmp.lt.u32.totalorder %s945_s12, %s1254_s11 }
 0x242   : > { %p947_p6 = pnand %p946_p13, %p1317_p0 }
 0x243   : > { %p952_p8 = por %p951_p5, %p950_p4 }
 0x244   : > { %p948_p10 = pneg %p947_p6 }
 0x245   : > { %p954_p2 = por %p953_p11, %p952_p8 }
 0x247   : > { %p955_p3 = pnand %p954_p2, %p948_p10 }
 0x249   : > { %958 = shalt.err (!%p955_p3)
}
 0x24a   : > { %s1009_s13 = smov 128   ;;  %s1010_s9 = smov 8  }
 0x24b   : > { %784 = dma.vmem_to_hbm [thread:$0]  (%p1317_p0), %s1249_s16, 256, %s1254_s11, %s477_s17, %s1009_s13, %s1009_s13, %s1010_s9  }
 0x24c PF: > { %s505_s30 = sand.u32 1, %s989_s18   ;;  %p1318_p7 = scmp.ne.s32.totalorder %s1308_s25, 0 }
 0x24d   : > { %p1319_p9 = scmp.ge.s32.totalorder %s1001_s21, 2  ;;  %s506_s7 = scalar_lea.sflag [#allocation4], %s505_s30 }
 0x24f   : > { %p798_p12 = pnand %p1319_p9, %p1318_p7 }
 0x251   : > { %984 = dma.done.wait (!%p798_p12), %s506_s7, 256  }
 0x252   : > { %986 = vsyncadd (!%p798_p12), %s506_s7, 4294967040  ;;  %p19_p1 = scmp.ge.s32.totalorder %s1157_s29, 4   ;;  %s1320_s18 = smov %s993_s19 }
 0x253   : > { %s1321_s19 = smov %s997_s20  ;;  %s1322_s20 = smov %s1173_s27 }
 0x254   : > { %s1323_s21 = smov %s1157_s29  ;;  %21 = sbr.rel (!%p19_p1) target bundleno = 6 (0x6), region = 93 }
 0x25b   :  { %511 = vsyncpa [#allocation3], 1 }
 0x25c   :  { %513 = vsyncpa [#allocation3 + $0x1], 1 }
 0x25d   :  { %514 = vsyncpa [#allocation6], 1 }
 0x25e   :  { %515 = vsyncpa [#allocation4], 1 }
 0x25f   :  { %517 = vsyncpa [#allocation4 + $0x1], 1 }

// kernel: tpu_custom_call.1
= control target key start
LH: loop header
LB: loop body
LE: loop exit
PB: predicated region body
PF: predicated region fallthrough
CT: control target
= control target key end

     0   :  { %10 = vsyncpa [#allocation3], 0  ;;  %s1298_s0 = inlined_call_operand.hbm [shape: f32[32,128], index: 0, kind: input, shape index: {}]   ;;  %s1299_s1 = inlined_call_operand.hbm [shape: f32[128,128], index: 1, kind: input, shape index: {}]   ;;  %s1300_s2 = inlined_call_operand.vmem [shape: f32[1,128], index: 2, kind: input, shape index: {}]   ;;  %s1301_s3 = inlined_call_operand.hbm [shape: f32[128,128], index: 3, kind: input, shape index: {}]   ;;  %s1302_s4 = inlined_call_operand.vmem [shape: f32[1,128], index: 4, kind: input, shape index: {}]   ;;  %s1303_s5 = inlined_call_operand.hbm [shape: f32[32,128], index: 5, kind: output, shape index: {}]  }
   0x1   :  { %12 = vsyncpa [#allocation3 + $0x1], 0 }
   0x2   :  { %13 = vsyncpa [#allocation6], 0 }
   0x3   :  { %14 = vsyncpa [#allocation4], 0 }
   0x4   :  { %16 = vsyncpa [#allocation4 + $0x1], 0  ;;  %s1041_s18 = smov 0   ;;  %s1043_s19 = smov 0  }
   0x5   :  { %s1045_s20 = smov 0   ;;  %s1047_s21 = smov 0  }
   0x6 LB: > { %s1062_s22 = sadd.s32 4294967295, %s1001_s21   ;;  %s582_s23 = sadd.s32 4294967294, %s1001_s21   ;;  %s1001_s21 = sphi %s1047_s21, %s1323_s21   ;;  %s997_s20 = sphi %s1045_s20, %s1322_s20   ;;  %s993_s19 = sphi %s1043_s19, %s1321_s19   ;;  %s989_s18 = sphi %s1041_s18, %s1320_s18  }
   0x7   : > { %p42_p0 = scmp.ne.s32.totalorder %s993_s19, %s989_s18  ;;  %p1304_p1 = scmp.eq.s32.totalorder %s1062_s22, 0 }
   0x8   : > { %p156_p3 = scmp.eq.s32.totalorder %s582_s23, 1  ;;  %p583_p5 = scmp.ge.s32.totalorder %s1001_s21, 1 }
   0x9   : > { %p1071_p4 = por %p1304_p1, %p42_p0  ;;  %p163_p7 = scmp.lt.s32.totalorder %s1001_s21, 3 }
   0xa   : > { %p1076_p6 = por %p156_p3, %p42_p0  ;;  %s1003_s27 = smov [#allocation5]  }
   0xb   : > { %s1307_s24 = scalar_select %p1071_p4, 1, 0 }
   0xc   : > { %s1308_s25 = scalar_select %p1076_p6, 1, 0 }
   0xd   : > { %p1081_p8 = pnand %p583_p5, %p163_p7  ;;  %s175_s28 = sshll.u32 %s1003_s27, 4  ;;  %s1085_s28 = int_to_ptr.vmem [resolvable:$true] %s175_s28 }
   0xe   : > { %s1004_s30 = smov [#allocation7]   ;;  %s845_s9 = scalar_lea.hbm %s1299_s1, 2048 }
   0xf   : > { %p786_p9 = pneg %p1081_p8  ;;  %s191_s6 = sshll.u32 %s1004_s30, 4  ;;  %s1096_s6 = int_to_ptr.vmem [resolvable:$true] %s191_s6 }
  0x10   : > { %p846_p12 = scmp.ne.s32.totalorder %s1299_s1, %s845_s9  ;;  %p852_p5 = scmp.lt.u32.totalorder %s845_s9, %s1299_s1 }
  0x11   : > { %p1092_p11 = pnand %p786_p9, %p1304_p1 }
  0x13   : > { %p847_p13 = pneg %p1092_p11 }
  0x15   : > { %p848_p0 = pnand %p847_p13, %p846_p12 }
  0x17   : > { %p849_p3 = pneg %p848_p0 }
  0x19   : > { %p854_p7 = pnand %p852_p5, %p849_p3 }
  0x1b   : > { %857 = shalt.err (!%p854_p7)
}
  0x1c   : > { %s858_s14 = scalar_lea.vmem %s1085_s28, 2048  ;;  %p866_p2 = scmp.lt.s32.totalorder %s1085_s28, %s1085_s28 }
  0x1d   : > { %p859_p9 = scmp.ne.s32.totalorder %s1085_s28, %s858_s14  ;;  %p867_p12 = scmp.lt.s32.totalorder %s858_s14, %s858_s14 }
  0x1f   : > { %p861_p10 = pnand %p859_p9, %p847_p13  ;;  %p868_p0 = por %p867_p12, %p866_p2 }
  0x21   : > { %p862_p1 = pneg %p861_p10 }
  0x23   : > { %p869_p6 = pnand %p868_p0, %p862_p1 }
  0x25   : > { %872 = shalt.err (!%p869_p6)
}
  0x26   : > { %s1005_s15 = smov 128   ;;  %s1006_s16 = smov 8  }
  0x27   : > { %789 = dma.hbm_to_vmem [thread:$0]  (!%p1092_p11), %s1299_s1, 2048, %s1085_s28, [#allocation6], %s1005_s15, %s1005_s15, %s1006_s16  }
  0x28   : > { %s873_s7 = scalar_lea.hbm %s1301_s3, 2048 }
  0x29   : > { %p874_p1 = scmp.ne.s32.totalorder %s1301_s3, %s873_s7  ;;  %p880_p10 = scmp.lt.u32.totalorder %s873_s7, %s1301_s3 }
  0x2b   : > { %p876_p2 = pnand %p874_p1, %p847_p13 }
  0x2d   : > { %p877_p6 = pneg %p876_p2 }
  0x2f   : > { %p882_p3 = pnand %p880_p10, %p877_p6 }
  0x31   : > { %885 = shalt.err (!%p882_p3)
}
  0x32   : > { %s886_s28 = scalar_lea.vmem %s1096_s6, 2048  ;;  %p894_p12 = scmp.lt.s32.totalorder %s1096_s6, %s1096_s6 }
  0x33   : > { %p887_p5 = scmp.ne.s32.totalorder %s1096_s6, %s886_s28  ;;  %p895_p0 = scmp.lt.s32.totalorder %s886_s28, %s886_s28 }
  0x35   : > { %p889_p7 = pnand %p887_p5, %p847_p13  ;;  %p896_p1 = por %p895_p0, %p894_p12 }
  0x37   : > { %p890_p9 = pneg %p889_p7 }
  0x39   : > { %p897_p2 = pnand %p896_p1, %p890_p9 }
  0x3b   : > { %900 = shalt.err (!%p897_p2)
}
  0x3c   : > { %792 = dma.hbm_to_vmem [thread:$0]  (!%p1092_p11), %s1301_s3, 2048, %s1096_s6, [#allocation6], %s1005_s15, %s1005_s15, %s1006_s16  }
  0x3d   : > { %s1157_s29 = sadd.s32 1, %s1001_s21   ;;  %s29_s14 = sadd.s32 1, %s997_s20 }
  0x3e   : > { %s26_s17 = ssub.s32 %s1001_s21, %s1157_s29  ;;  %p36_p13 = scmp.ne.s32.totalorder %s997_s20, %s993_s19 }
  0x3f   : > { %p27_p6 = scmp.eq.s32.totalorder %s26_s17, 0  ;;  %p37_p10 = scmp.eq.s32.totalorder %s1001_s21, 0 }
  0x40   : > { %p1311_p3 = scmp.eq.s32.totalorder %s1062_s22, 1  ;;  %p803_p7 = scmp.lt.s32.totalorder %s1001_s21, 2 }
  0x41   : > { %s1173_s27 = scalar_select %p27_p6, %s997_s20, %s29_s14  }
  0x42   : > { %p1167_p5 = por %p1311_p3, %p36_p13  ;;  %p38_p9 = por %p37_p10, %p36_p13 }
  0x43   : > { %s208_s30 = sand.u32 1, %s997_s20   ;;  %s602_s6 = sshll.u32 %s1001_s21, 8 }
  0x44   : > { %s1312_s23 = scalar_select %p1167_p5, 1, 0 }
  0x45   : > { %s587_s7 = sshll.u32 %s208_s30, 4  ;;  %s1180_s10 = scalar_lea.hbm %s1298_s0, %s602_s6 }
  0x46   : > { %s212_s11 = scalar_lea.vmem [#allocation2], %s587_s7  ;;  %p1184_p11 = pnand %p803_p7, %p38_p9 }
  0x47   : > { %s219_s28 = sshll.u32 %s212_s11, 4  ;;  %s1188_s13 = scalar_lea.sflag [#allocation3], %s208_s30  ;;  %s1182_s28 = int_to_ptr.vmem [resolvable:$true] %s219_s28 }
  0x48   : > { %s901_s14 = scalar_lea.hbm %s1180_s10, 256  ;;  %p903_p0 = pneg %p1184_p11 }
  0x49   : > { %p902_p12 = scmp.ne.s32.totalorder %s1180_s10, %s901_s14  ;;  %s906_s6 = scalar_lea.hbm %s1298_s0, 512 }
  0x4a   : > { %p907_p13 = scmp.lt.u32.totalorder %s1180_s10, %s1298_s0  ;;  %p908_p6 = scmp.lt.u32.totalorder %s906_s6, %s901_s14 }
  0x4b   : > { %p904_p1 = pnand %p903_p0, %p902_p12  ;;  %p910_p3 = scmp.lt.u32.totalorder %s901_s14, %s1180_s10 }
  0x4c   : > { %p909_p10 = por %p908_p6, %p907_p13 }
  0x4d   : > { %p905_p2 = pneg %p904_p1 }
  0x4e   : > { %p911_p7 = por %p910_p3, %p909_p10 }
  0x50   : > { %p912_p9 = pnand %p911_p7, %p905_p2 }
  0x52   : > { %915 = shalt.err (!%p912_p9)
}
  0x53   : > { %s916_s30 = scalar_lea.vmem %s1182_s28, 256  ;;  %s1007_s11 = smov [#allocation2]  }
  0x54   : > { %p917_p12 = scmp.ne.s32.totalorder %s1182_s28, %s916_s30  ;;  %s921_s17 = sshll.u32 %s1007_s11, 4  ;;  %s922_s17 = int_to_ptr.vmem [resolvable:$false] %s921_s17 }
  0x55   : > { %s923_s7 = scalar_lea.vmem %s922_s17, 512  ;;  %p924_p4 = scmp.lt.s32.totalorder %s1182_s28, %s922_s17 }
  0x56   : > { %p919_p1 = pnand %p917_p12, %p903_p0  ;;  %p925_p13 = scmp.lt.s32.totalorder %s923_s7, %s916_s30 }
  0x58   : > { %p920_p5 = pneg %p919_p1  ;;  %p926_p6 = por %p925_p13, %p924_p4 }
  0x5a   : > { %p927_p10 = pnand %p926_p6, %p920_p5 }
  0x5c   : > { %930 = shalt.err (!%p927_p10)
}
  0x5d   : > { %796 = dma.hbm_to_vmem [thread:$0]  (!%p1184_p11), %s1180_s10, 256, %s1182_s28, %s1188_s13, %s1005_s15, %s1005_s15, %s1006_s16  }
  0x5e   : > { %231 = sbr.rel (%p1081_p8) target bundleno = 588 (0x24c), region = 40  ;;  %s1222_s14 = sand.u32 (!%p1081_p8), 1, %s993_s19  }
  0x5f   : > { %s591_s6 = sshll.u32 (!%p1081_p8), %s1222_s14, 4  ;;  %s234_s8 = scalar_lea.sflag (!%p1081_p8), [#allocation3], %s1222_s14 }
  0x60   : > { %s1228_s12 = scalar_lea.vmem (!%p1081_p8), [#allocation2], %s591_s6  ;;  %p1314_p4 = scmp.ne.s32.totalorder (!%p1081_p8), %s1307_s24, 0 }
  0x65   : > { %976 = dma.done.wait (%p1314_p4), %s234_s8, 256  }
  0x66   : > { %978 = vsyncadd (%p1314_p4), %s234_s8, 4294967040  ;;  %p1315_p5 = scmp.eq.s32.totalorder %s1062_s22, 0 }
  0x68   : > { %980 = dma.done.wait (%p1315_p5), [#allocation6], 4096   ;;  %p1316_p8 = pmov %p1315_p5 }
  0x69   : > { %v276_v0 = vld [vmem:[#allocation5] sm:$0xff]  ;;  %v277_v1 = vld [vmem:[#allocation5 + $0x8] sm:$0xff]  ;;  %v278_v2 = vld [vmem:[#allocation5 + $0x10] sm:$0xff]  ;;  %s271_s15 = scalar_lea.vmem [#allocation8], %s591_s6  ;;  %s603_s13 = sshll.u32 %s1062_s22, 8 }
  0x6a   : > { %982 = vsyncadd (%p1316_p8), [#allocation6], 4294963200  ;;  %v710_v3 = vpack.c.bf16 %v277_v1, %v276_v0  ;;  %v279_v4 = vld [vmem:[#allocation5 + $0x18] sm:$0xff]  ;;  %v280_v6 = vld [vmem:[#allocation5 + $0x20] sm:$0xff]  ;;  %s490_s16 = sshll.u32 %s271_s15, 4  ;;  %s1254_s11 = scalar_lea.hbm %s1303_s5, %s603_s13  ;;  %s1249_s16 = int_to_ptr.vmem [resolvable:$true] %s490_s16 }
  0x6b   : > { %v714_v5 = vpack.c.bf16 %v279_v4, %v278_v2  ;;  %v281_v7 = vld [vmem:[#allocation5 + $0x28] sm:$0xff]  ;;  %v282_v9 = vld [vmem:[#allocation5 + $0x30] sm:$0xff]  ;;  %v283_v10 = vld [vmem:[#allocation5 + $0x38] sm:$0xff]  ;;  %s477_s17 = scalar_lea.sflag [#allocation4], %s1222_s14  ;;  %s931_s7 = scalar_lea.vmem %s1249_s16, 256 }
  0x6c   : > { %711 = vmatprep.subr.bf16.mxu0 %v710_v3  ;;  %v718_v8 = vpack.c.bf16 %v281_v7, %v280_v6  ;;  %v274_v11 = vld [vmem:[%s1228_s12] sm:$0xff]  ;;  %v377_v13 = vld [vmem:[#allocation7 + $0x8] sm:$0xff]  ;;  %v379_v16 = vld [vmem:[#allocation7 + $0x18] sm:$0xff]  ;;  %v722_v20 = vpack.c.bf16 %v283_v10, %v282_v9  ;;  %p932_p11 = scmp.ne.s32.totalorder %s1249_s16, %s931_s7  ;;  %p1317_p0 = scmp.ne.s32.totalorder %s1312_s23, 0 }
  0x6d   : > { %713 = vmatpush3.bf16.msra.mxu0 %v710_v3  ;;  %672 = vmatprep.mubr.f32.mxu0 %v274_v11  ;;  %v376_v12 = vld [vmem:[#allocation7] sm:$0xff]  ;;  %v378_v14 = vld [vmem:[#allocation7 + $0x10] sm:$0xff]  ;;  %v381_v19 = vld [vmem:[#allocation7 + $0x28] sm:$0xff]  ;;  %s1008_s22 = smov [#allocation8]  }
  0x6e   : > { %715 = vmatprep.subr.bf16.mxu0 %v714_v5  ;;  %v742_v15 = vpack.c.bf16 %v377_v13, %v376_v12  ;;  %v746_v17 = vpack.c.bf16 %v379_v16, %v378_v14  ;;  %v380_v18 = vld [vmem:[#allocation7 + $0x20] sm:$0xff]  ;;  %v285_v22 = vld [vmem:[#allocation5 + $0x48] sm:$0xff]  ;;  %v382_v24 = vld [vmem:[#allocation7 + $0x30] sm:$0xff]  ;;  %p933_p2 = pnand %p932_p11, %p1317_p0  ;;  %s935_s6 = sshll.u32 %s1008_s22, 4  ;;  %s936_s6 = int_to_ptr.vmem [resolvable:$false] %s935_s6 }
  0x6f   : > { %v284_v21 = vld [vmem:[#allocation5 + $0x40] sm:$0xff]  ;;  %v750_v23 = vpack.c.bf16 %v381_v19, %v380_v18  ;;  %v383_v25 = vld [vmem:[#allocation7 + $0x38] sm:$0xff]  ;;  %v286_v27 = vld [vmem:[#allocation5 + $0x50] sm:$0xff]  ;;  %s937_s8 = scalar_lea.vmem %s936_s6, 512  ;;  %p938_p7 = scmp.lt.s32.totalorder %s1249_s16, %s936_s6 }
  0x70   : > { %743 = vmatprep.subr.bf16.mxu1 %v742_v15  ;;  %v726_v26 = vpack.c.bf16 %v285_v22, %v284_v21  ;;  %v287_v28 = vld [vmem:[#allocation5 + $0x58] sm:$0xff]  ;;  %v754_v29 = vpack.c.bf16 %v383_v25, %v382_v24  ;;  %v384_v30 = vld [vmem:[#allocation7 + $0x40] sm:$0xff]  ;;  %v385_v31 = vld [vmem:[#allocation7 + $0x48] sm:$0xff]  ;;  %p934_p3 = pneg %p933_p2  ;;  %p939_p9 = scmp.lt.s32.totalorder %s937_s8, %s931_s7 }
  0x71   : > { %717 = vmatpush3.bf16.msra.mxu0 %v714_v5  ;;  %745 = vmatpush3.bf16.msra.mxu1 %v742_v15  ;;  %v730_v32 = vpack.c.bf16 %v287_v28, %v286_v27  ;;  %v288_v33 = vld [vmem:[#allocation5 + $0x60] sm:$0xff]  ;;  %v289_v34 = vld [vmem:[#allocation5 + $0x68] sm:$0xff]  ;;  %v758_v35 = vpack.c.bf16 %v385_v31, %v384_v30  ;;  %v386_v36 = vld [vmem:[#allocation7 + $0x50] sm:$0xff] }
  0x72   : > { %719 = vmatprep.subr.bf16.mxu0 %v718_v8  ;;  %747 = vmatprep.subr.bf16.mxu1 %v746_v17  ;;  %v387_v37 = vld [vmem:[#allocation7 + $0x58] sm:$0xff]  ;;  %v734_v38 = vpack.c.bf16 %v289_v34, %v288_v33  ;;  %v290_v39 = vld [vmem:[#allocation5 + $0x70] sm:$0xff]  ;;  %v388_v42 = vld [vmem:[#allocation7 + $0x60] sm:$0xff]  ;;  %p940_p12 = por %p939_p9, %p938_p7 }
  0x73   : > { %v291_v40 = vld [vmem:[#allocation5 + $0x78] sm:$0xff]  ;;  %v762_v41 = vpack.c.bf16 %v387_v37, %v386_v36  ;;  %v389_v43 = vld [vmem:[#allocation7 + $0x68] sm:$0xff]  ;;  %v390_v47 = vld [vmem:[#allocation7 + $0x70] sm:$0xff] }
  0x74   : > { %v738_v44 = vpack.c.bf16 %v291_v40, %v290_v39  ;;  %v766_v45 = vpack.c.bf16 %v389_v43, %v388_v42  ;;  %v275_v46 = vld [vmem:[%s1228_s12 + $0x8] sm:$0xff]  ;;  %v595_v50 = vld [vmem:[%s1300_s2] ss:$0 sm:$0xff]  ;;  %p941_p1 = pnand %p940_p12, %p934_p3 }
  0x75   : > { %721 = vmatpush3.bf16.msra.mxu0 %v718_v8  ;;  %749 = vmatpush3.bf16.msra.mxu1 %v746_v17  ;;  %v391_v48 = vld [vmem:[#allocation7 + $0x78] sm:$0xff]  ;;  %v596_v57 = vld [vmem:[%s1302_s4] ss:$0 sm:$0xff] }
  0x76   : > { %723 = vmatprep.subr.bf16.mxu0 %v722_v20  ;;  %751 = vmatprep.subr.bf16.mxu1 %v750_v23  ;;  %v770_v49 = vpack.c.bf16 %v391_v48, %v390_v47 }
  0x79   : > { %725 = vmatpush3.bf16.msra.mxu0 %v722_v20  ;;  %753 = vmatpush3.bf16.msra.mxu1 %v750_v23 }
  0x7a   : > { %727 = vmatprep.subr.bf16.mxu0 %v726_v26  ;;  %755 = vmatprep.subr.bf16.mxu1 %v754_v29 }
  0x7d   : > { %729 = vmatpush3.bf16.msra.mxu0 %v726_v26  ;;  %757 = vmatpush3.bf16.msra.mxu1 %v754_v29 }
  0x7e   : > { %731 = vmatprep.subr.bf16.mxu0 %v730_v32  ;;  %759 = vmatprep.subr.bf16.mxu1 %v758_v35 }
  0x81   : > { %733 = vmatpush3.bf16.msra.mxu0 %v730_v32  ;;  %761 = vmatpush3.bf16.msra.mxu1 %v758_v35 }
  0x82   : > { %735 = vmatprep.subr.bf16.mxu0 %v734_v38  ;;  %763 = vmatprep.subr.bf16.mxu1 %v762_v41 }
  0x85   : > { %737 = vmatpush3.bf16.msra.mxu0 %v734_v38  ;;  %765 = vmatpush3.bf16.msra.mxu1 %v762_v41 }
  0x86   : > { %739 = vmatprep.subr.bf16.mxu0 %v738_v44  ;;  %767 = vmatprep.subr.bf16.mxu1 %v766_v45 }
  0x89   : > { %741 = vmatpush3.bf16.msra.mxu0 %v738_v44  ;;  %769 = vmatpush3.bf16.msra.mxu1 %v766_v45 }
  0x8a   : > { %771 = vmatprep.subr.bf16.mxu1 %v770_v49 }
  0x8c   : > { %673 = vmatmul.mubr.f32.vlgmr.msra.gmra.mrb[0].mxu0 %v275_v46 }
  0x8d   : > { %773 = vmatpush3.bf16.msra.mxu1 %v770_v49 }
 0x15f   : > { %v674_v51 = vpop.f32.mrb[0].mxu0 }
 0x160   : > { %v371_v52 = vadd.f32 %v674_v51, %v595_v50  ;;  %v365_v53 = vpop.f32.mrb[1].mxu0 }
 0x161   : > { %v366_v54 = vadd.f32 %v595_v50, %v365_v53 }
 0x162   : > { %v375_v56 = vmax.f32 %v371_v52, 0.0 }
 0x163   : > { %v374_v55 = vmax.f32 %v366_v54, 0.0 }
 0x165   : > { %707 = vmatprep.mubr.f32.mxu1 %v374_v55 }
 0x166   : > { %708 = vmatmul.mubr.f32.vlgmr.msra.gmra.mrb[0].mxu1 %v375_v56 }
 0x239   : > { %v709_v58 = vpop.f32.mrb[0].mxu1 }
 0x23a   : > { %v471_v59 = vadd.f32 %v709_v58, %v596_v57  ;;  %v465_v60 = vpop.f32.mrb[1].mxu1 }
 0x23b   : > { %v466_v61 = vadd.f32 %v596_v57, %v465_v60 }
 0x23c   : > { %475 = vst [vmem:[%s271_s15 + $0x8] sm:$0xff] %v471_v59 }
 0x23d   : > { %474 = vst [vmem:[%s271_s15] sm:$0xff] %v466_v61 }
 0x23e   : > { %944 = shalt.err (!%p941_p1)
}
 0x23f   : > { %s945_s12 = scalar_lea.hbm %s1254_s11, 256  ;;  %s949_s15 = scalar_lea.hbm %s1303_s5, 512 }
 0x240   : > { %p946_p13 = scmp.ne.s32.totalorder %s1254_s11, %s945_s12  ;;  %p950_p4 = scmp.lt.u32.totalorder %s1254_s11, %s1303_s5 }
 0x241   : > { %p951_p5 = scmp.lt.u32.totalorder %s949_s15, %s945_s12  ;;  %p953_p11 = scmp.lt.u32.totalorder %s945_s12, %s1254_s11 }
 0x242   : > { %p947_p6 = pnand %p946_p13, %p1317_p0 }
 0x243   : > { %p952_p8 = por %p951_p5, %p950_p4 }
 0x244   : > { %p948_p10 = pneg %p947_p6 }
 0x245   : > { %p954_p2 = por %p953_p11, %p952_p8 }
 0x247   : > { %p955_p3 = pnand %p954_p2, %p948_p10 }
 0x249   : > { %958 = shalt.err (!%p955_p3)
}
 0x24a   : > { %s1009_s13 = smov 128   ;;  %s1010_s9 = smov 8  }
 0x24b   : > { %784 = dma.vmem_to_hbm [thread:$0]  (%p1317_p0), %s1249_s16, 256, %s1254_s11, %s477_s17, %s1009_s13, %s1009_s13, %s1010_s9  }
 0x24c PF: > { %s505_s30 = sand.u32 1, %s989_s18   ;;  %p1318_p7 = scmp.ne.s32.totalorder %s1308_s25, 0 }
 0x24d   : > { %p1319_p9 = scmp.ge.s32.totalorder %s1001_s21, 2  ;;  %s506_s7 = scalar_lea.sflag [#allocation4], %s505_s30 }
 0x24f   : > { %p798_p12 = pnand %p1319_p9, %p1318_p7 }
 0x251   : > { %984 = dma.done.wait (!%p798_p12), %s506_s7, 256  }
 0x252   : > { %986 = vsyncadd (!%p798_p12), %s506_s7, 4294967040  ;;  %p19_p1 = scmp.ge.s32.totalorder %s1157_s29, 4   ;;  %s1320_s18 = smov %s993_s19 }
 0x253   : > { %s1321_s19 = smov %s997_s20  ;;  %s1322_s20 = smov %s1173_s27 }
 0x254   : > { %s1323_s21 = smov %s1157_s29  ;;  %21 = sbr.rel (!%p19_p1) target bundleno = 6 (0x6), region = 93 }
 0x25b   :  { %511 = vsyncpa [#allocation3], 1 }
 0x25c   :  { %513 = vsyncpa [#allocation3 + $0x1], 1 }
 0x25d   :  { %514 = vsyncpa [#allocation6], 1 }
 0x25e   :  { %515 = vsyncpa [#allocation4], 1 }
 0x25f   :  { %517 = vsyncpa [#allocation4 + $0x1], 1 }

</bundles_post_ra>
